<compile_context>
chip_gen: v5e
topology: v5e:2x2
jax: 0.10.0
libtpu: 0.0.40
codegen_flags: <defaults>
</compile_context>

<pallas_src>
import jax
import jax.numpy as jnp
from jax.experimental import pallas as pl
from jax.experimental.pallas import tpu as pltpu

LAYER_NORM_EPS = 1e-12


# ----------------------------------------------------------------------------- helpers


def _layer_norm_rows(x, gamma, beta):
    """Row-wise LayerNorm in f32. One-pass stats = two independent lane reductions."""
    inv_h = 1.0 / float(x.shape[-1])
    mean = jnp.sum(x, axis=-1, keepdims=True) * inv_h
    mean_sq = jnp.sum(x * x, axis=-1, keepdims=True) * inv_h
    var = jnp.maximum(mean_sq - mean * mean, 0.0)  # clamp: no rsqrt(<0) from cancellation
    return (x - mean) * jax.lax.rsqrt(var + LAYER_NORM_EPS) * gamma + beta


def _vmem_capacity_bytes():
    try:
        return int(pltpu.get_tpu_info().vmem_capacity_bytes)
    except Exception:
        return 128 << 20


def _pick_block_rows(m, h):
    """Row-tile size: large lane/sublane-dense tiles, generation/VMEM aware."""
    target = 512 if h <= 1024 else 256
    if _vmem_capacity_bytes() <= (64 << 20):  # v7x: half the VMEM of v5e/v6e
        target = 256
    if m >= target:
        return target
    if m < 8:
        return m                      # block == full array extent (allowed)
    return ((m + 7) // 8) * 8         # single sublane-aligned tile covering all rows


def _pick_k_tile(h):
    for tk in (512, 256, 128):
        if h % tk == 0:
            return tk
    return None


def _vmem_limit_bytes(block_rows, h, tk, act_bytes, out_bytes, w_bytes, weight_bufs):
    if tk is None:
        total = (2 * block_rows * h * act_bytes * 2        # hid + residual, double-buffered
                 + 2 * block_rows * h * out_bytes          # output, double-buffered
                 + weight_bufs * h * h * w_bytes           # resident weight
                 + 8 * h * 4)                              # packed (3, h) params (padded)
    else:
        total = (2 * block_rows * tk * act_bytes           # hid K-slices, double-buffered
                 + 2 * block_rows * h * act_bytes          # residual
                 + 2 * block_rows * h * out_bytes          # output
                 + 2 * tk * h * w_bytes                    # streamed weight K-slices
                 + block_rows * h * 4                      # f32 accumulator scratch
                 + 8 * h * 4)                              # packed params
    limit = max(int(total * 1.5) + (8 << 20), 32 << 20)    # margin for internal scratch
    return min(limit, _vmem_capacity_bytes())


# ----------------------------------------------------------------------------- kernels


def _kernel_resident(hid_ref, inp_ref, w_ref, p_ref, out_ref):
    """Weight fully resident in VMEM. One MXU matmul + fused epilogue per row tile."""
    x = jnp.dot(hid_ref[...].astype(w_ref.dtype), w_ref[...],
                preferred_element_type=jnp.float32)
    x = x + p_ref[0:1, :] + inp_ref[...].astype(jnp.float32)      # bias + residual
    y = _layer_norm_rows(x, p_ref[1:2, :], p_ref[2:3, :])
    out_ref[...] = y.astype(out_ref.dtype)


def _kernel_ktiled(hid_ref, inp_ref, w_ref, p_ref, out_ref, acc_ref):
    """K-tiled variant: grid=(row_tiles, H//tk); f32 accumulator; epilogue on last k."""
    k = pl.program_id(1)

    @pl.when(k == 0)
    def _init():
        acc_ref[...] = jnp.zeros_like(acc_ref)

    acc_ref[...] += jnp.dot(hid_ref[...].astype(w_ref.dtype), w_ref[...],
                            preferred_element_type=jnp.float32)

    @pl.when(k == pl.num_programs(1) - 1)
    def _finalize():
        x = acc_ref[...] + p_ref[0:1, :] + inp_ref[...].astype(jnp.float32)
        y = _layer_norm_rows(x, p_ref[1:2, :], p_ref[2:3, :])
        out_ref[...] = y.astype(out_ref.dtype)


# ----------------------------------------------------------------------------- wrapper


def albert_self_output(hidden_states, input_tensor, params, *,
                       matmul_dtype=jnp.bfloat16,
                       block_rows=None, k_tile=None, k_tile_threshold=2048):
    """Fused Linear + residual + LayerNorm (AlbertSelfOutput forward, dropout = identity).

    hidden_states, input_tensor: (..., H)
    params = (W, b, gamma, beta) with W = dense.weight.T (so x @ W + b == torch Linear).
    """
    orig_shape = hidden_states.shape
    H = orig_shape[-1]
    M = hidden_states.size // H

    W, b, gamma, beta = params
    w2 = W if matmul_dtype is None else W.astype(matmul_dtype)
    params_packed = jnp.stack([b, gamma, beta], axis=0).astype(jnp.float32)  # (3, H)

    hid2 = hidden_states.reshape(M, H)
    inp2 = input_tensor.reshape(M, H)

    if block_rows is None:
        block_rows = _pick_block_rows(M, H)
    num_row_tiles = pl.cdiv(M, block_rows)

    if k_tile is None and H >= k_tile_threshold:
        k_tile = _pick_k_tile(H)
    if k_tile is not None:
        assert H % k_tile == 0 and k_tile % 128 == 0, \
            "k_tile must be a multiple of 128 that divides H"

    act_bytes = hid2.dtype.itemsize
    out_bytes = hid2.dtype.itemsize
    w_bytes = w2.dtype.itemsize

    def _run(single_buffer_invariants):
        inv_mode = pl.Buffered(1) if single_buffer_invariants else None
        weight_bufs = 1 if single_buffer_invariants else 2
        vmem_limit = _vmem_limit_bytes(block_rows, H, k_tile,
                                       act_bytes, out_bytes, w_bytes, weight_bufs)

        if k_tile is None:
            grid = (num_row_tiles,)
            dims = ("parallel",)
            kernel = _kernel_resident
            in_specs = [
                pl.BlockSpec((block_rows, H), lambda i: (i, 0)),                      # hid rows
                pl.BlockSpec((block_rows, H), lambda i: (i, 0)),                      # residual
                pl.BlockSpec((H, H), lambda i: (0, 0), pipeline_mode=inv_mode),       # weight
                pl.BlockSpec((3, H), lambda i: (0, 0), pipeline_mode=inv_mode),       # b/gamma/beta
            ]
            out_specs = pl.BlockSpec((block_rows, H), lambda i: (i, 0))
            scratch = []
        else:
            grid = (num_row_tiles, H // k_tile)
            dims = ("parallel", "arbitrary")
            kernel = _kernel_ktiled
            in_specs = [
                pl.BlockSpec((block_rows, k_tile), lambda i, k: (i, k)),              # hid K-slice
                pl.BlockSpec((block_rows, H), lambda i, k: (i, 0)),                   # residual
                pl.BlockSpec((k_tile, H), lambda i, k: (k, 0)),                       # weight K-slice
                pl.BlockSpec((3, H), lambda i, k: (0, 0), pipeline_mode=inv_mode),    # b/gamma/beta
            ]
            out_specs = pl.BlockSpec((block_rows, H), lambda i, k: (i, 0))
            scratch = [pltpu.VMEM((block_rows, H), jnp.float32)]

        grid_spec = pltpu.PrefetchScalarGridSpec(
            num_scalar_prefetch=0,
            grid=grid,
            in_specs=in_specs,
            out_specs=out_specs,
            scratch_shapes=scratch,
        )
        return pl.pallas_call(
            kernel,
            out_shape=jax.ShapeDtypeStruct((M, H), hidden_states.dtype),
            grid_spec=grid_spec,
            compiler_params=pltpu.CompilerParams(
                dimension_semantics=dims,
                vmem_limit_bytes=vmem_limit,
            ),
        )(hid2, inp2, w2, params_packed)

    try:
        out = _run(True)
    except Exception:
        # Fallback if this jax build rejects pipeline_mode=pl.Buffered(1).
        out = _run(False)

    return out.reshape(orig_shape)


# ----------------------------------------------------------------------------- reference


def reference(hidden_states, input_tensor, params):
    """Pure-JAX f32 reference matching the PyTorch forward (dropout = identity)."""
    W, b, gamma, beta = params
    x = hidden_states @ W + b
    x = x + input_tensor
    mean = x.mean(-1, keepdims=True)
    var = ((x - mean) ** 2).mean(-1, keepdims=True)
    x = (x - mean) / jnp.sqrt(var + LAYER_NORM_EPS)
    return x * gamma + beta


# ----------------------------------------------------------------------------- self-test


if __name__ == "__main__":
    def make_case(key, B, S, H):
        ks = jax.random.split(key, 6)
        hs = jax.random.normal(ks[0], (B, S, H), dtype=jnp.float32)
        it = jax.random.normal(ks[1], (B, S, H), dtype=jnp.float32)
        W = jax.random.normal(ks[2], (H, H), dtype=jnp.float32) * 0.02
        b = jax.random.normal(ks[3], (H,), dtype=jnp.float32) * 0.02
        g = 1.0 + jax.random.normal(ks[4], (H,), dtype=jnp.float32) * 0.02
        bt = jax.random.normal(ks[5], (H,), dtype=jnp.float32) * 0.02
        return hs, it, (W, b, g, bt)

    key = jax.random.PRNGKey(0)
    k1, k2 = jax.random.split(key)

    # Case 1: module-scale shapes (B=2, S=8, H=32) -> resident-weight path.
    hs, it, params = make_case(k1, 2, 8, 32)
    out = jax.block_until_ready(albert_self_output(hs, it, params))
    ref = reference(hs, it, params)
    assert out.shape == hs.shape
    assert jnp.allclose(out, ref, rtol=2e-2, atol=2e-2), "resident path mismatch vs reference"

    # Case 2: lane-aligned H, non-multiple-of-8 row count, forced K-tiled path
    # (exercises the cdiv/masked partial row tile and the accumulator epilogue).
    hs2, it2, params2 = make_case(k2, 3, 6, 256)
    out2 = jax.block_until_ready(albert_self_output(hs2, it2, params2, k_tile=128))
    ref2 = reference(hs2, it2, params2)
    assert out2.shape == hs2.shape
    assert jnp.allclose(out2, ref2, rtol=2e-2, atol=2e-2), "k-tiled path mismatch vs reference"

    print("KERNEL_OK")
</pallas_src>

<mosaic_0001>
module attributes {stable_mosaic.version = 11 : i64} {
  func.func @_kernel_resident(%arg0: i32, %arg1: memref<16x32xf32, #tpu.memory_space<vmem>>, %arg2: memref<16x32xf32, #tpu.memory_space<vmem>>, %arg3: memref<32x32xbf16, #tpu.memory_space<vmem>>, %arg4: memref<3x32xf32, #tpu.memory_space<vmem>>, %arg5: memref<16x32xf32, #tpu.memory_space<vmem>>) attributes {dimension_semantics = [#tpu.dimension_semantics<parallel>], iteration_bounds = array<i64: 1>, scalar_prefetch = 0 : i64, scratch_operands = 0 : i64, tpu.core_type = #tpu.core_type<tc>, window_params = [{transform_indices = @transform_0, window_bounds = array<i64: 16, 32>}, {transform_indices = @transform_1, window_bounds = array<i64: 16, 32>}, {pipeline_mode = #tpu.pipeline_mode<synchronous>, transform_indices = @transform_2, window_bounds = array<i64: 32, 32>}, {pipeline_mode = #tpu.pipeline_mode<synchronous>, transform_indices = @transform_3, window_bounds = array<i64: 3, 32>}, {transform_indices = @transform_4, window_bounds = array<i64: 16, 32>}]} {
    %c0 = arith.constant 0 : index
    %c0_0 = arith.constant 0 : index
    %0 = vector.load %arg1[%c0, %c0_0] : memref<16x32xf32, #tpu.memory_space<vmem>>, vector<16x32xf32>
    %1 = arith.truncf %0 : vector<16x32xf32> to vector<16x32xbf16>
    %c0_1 = arith.constant 0 : index
    %c0_2 = arith.constant 0 : index
    %2 = vector.load %arg3[%c0_1, %c0_2] : memref<32x32xbf16, #tpu.memory_space<vmem>>, vector<32x32xbf16>
    %cst = arith.constant dense<0.000000e+00> : vector<16x32xf32>
    %3 = tpu.matmul %1, %2, %cst {dimension_numbers = #tpu.dot_dimension_numbers<[1], [0], [0], [1], [0, 0, 1, 1], [], []>} : vector<16x32xbf16>, vector<32x32xbf16>, vector<16x32xf32> -> vector<16x32xf32>
    %c0_3 = arith.constant 0 : index
    %c0_4 = arith.constant 0 : index
    %4 = vector.load %arg4[%c0_3, %c0_4] : memref<3x32xf32, #tpu.memory_space<vmem>>, vector<1x32xf32>
    %5 = vector.broadcast %4 : vector<1x32xf32> to vector<16x32xf32>
    %6 = arith.addf %3, %5 : vector<16x32xf32>
    %c0_5 = arith.constant 0 : index
    %c0_6 = arith.constant 0 : index
    %7 = vector.load %arg2[%c0_5, %c0_6] : memref<16x32xf32, #tpu.memory_space<vmem>>, vector<16x32xf32>
    %8 = arith.addf %6, %7 : vector<16x32xf32>
    %c1 = arith.constant 1 : index
    %c0_7 = arith.constant 0 : index
    %9 = vector.load %arg4[%c1, %c0_7] : memref<3x32xf32, #tpu.memory_space<vmem>>, vector<1x32xf32>
    %c2 = arith.constant 2 : index
    %c0_8 = arith.constant 0 : index
    %10 = vector.load %arg4[%c2, %c0_8] : memref<3x32xf32, #tpu.memory_space<vmem>>, vector<1x32xf32>
    %cst_9 = arith.constant dense<0.000000e+00> : vector<16xf32>
    %11 = vector.multi_reduction <add>, %8, %cst_9 [1] : vector<16x32xf32> to vector<16xf32>
    %12 = vector.shape_cast %11 : vector<16xf32> to vector<16x1xf32>
    %cst_10 = arith.constant 3.125000e-02 : f32
    %13 = vector.broadcast %cst_10 : f32 to vector<16x1xf32>
    %14 = arith.mulf %12, %13 : vector<16x1xf32>
    %15 = arith.mulf %8, %8 : vector<16x32xf32>
    %cst_11 = arith.constant dense<0.000000e+00> : vector<16xf32>
    %16 = vector.multi_reduction <add>, %15, %cst_11 [1] : vector<16x32xf32> to vector<16xf32>
    %17 = vector.shape_cast %16 : vector<16xf32> to vector<16x1xf32>
    %cst_12 = arith.constant 3.125000e-02 : f32
    %18 = vector.broadcast %cst_12 : f32 to vector<16x1xf32>
    %19 = arith.mulf %17, %18 : vector<16x1xf32>
    %20 = arith.mulf %14, %14 : vector<16x1xf32>
    %21 = arith.subf %19, %20 : vector<16x1xf32>
    %cst_13 = arith.constant 0.000000e+00 : f32
    %22 = vector.broadcast %cst_13 : f32 to vector<16x1xf32>
    %23 = arith.maximumf %21, %22 : vector<16x1xf32>
    %24 = vector.broadcast %14 : vector<16x1xf32> to vector<16x32xf32>
    %25 = arith.subf %8, %24 : vector<16x32xf32>
    %cst_14 = arith.constant 9.99999996E-13 : f32
    %26 = vector.broadcast %cst_14 : f32 to vector<16x1xf32>
    %27 = arith.addf %23, %26 : vector<16x1xf32>
    %28 = math.rsqrt %27 : vector<16x1xf32>
    %29 = vector.broadcast %28 : vector<16x1xf32> to vector<16x32xf32>
    %30 = arith.mulf %25, %29 : vector<16x32xf32>
    %31 = vector.broadcast %9 : vector<1x32xf32> to vector<16x32xf32>
    %32 = arith.mulf %30, %31 : vector<16x32xf32>
    %33 = vector.broadcast %10 : vector<1x32xf32> to vector<16x32xf32>
    %34 = arith.addf %32, %33 : vector<16x32xf32>
    %c0_15 = arith.constant 0 : index
    %c0_16 = arith.constant 0 : index
    %35 = vector.load %arg5[%c0_15, %c0_16] : memref<16x32xf32, #tpu.memory_space<vmem>>, vector<16x32xf32>
    tpu.vector_store %arg5[%c0_15, %c0_16], %34 {strides = array<i32>} : memref<16x32xf32, #tpu.memory_space<vmem>>, vector<16x32xf32>,
    return
  }
  func.func @transform_0(%arg0: i32) -> (i32, i32) {
    %c0_i32 = arith.constant 0 : i32
    %c0_i32_0 = arith.constant 0 : i32
    return %arg0, %c0_i32 : i32, i32
  }
  func.func @transform_1(%arg0: i32) -> (i32, i32) {
    %c0_i32 = arith.constant 0 : i32
    %c0_i32_0 = arith.constant 0 : i32
    return %arg0, %c0_i32 : i32, i32
  }
  func.func @transform_2(%arg0: i32) -> (i32, i32) {
    %c0_i32 = arith.constant 0 : i32
    %c0_i32_0 = arith.constant 0 : i32
    %c0_i32_1 = arith.constant 0 : i32
    return %c0_i32, %c0_i32_0 : i32, i32
  }
  func.func @transform_3(%arg0: i32) -> (i32, i32) {
    %c0_i32 = arith.constant 0 : i32
    %c0_i32_0 = arith.constant 0 : i32
    %c0_i32_1 = arith.constant 0 : i32
    return %c0_i32, %c0_i32_0 : i32, i32
  }
  func.func @transform_4(%arg0: i32) -> (i32, i32) {
    %c0_i32 = arith.constant 0 : i32
    %c0_i32_0 = arith.constant 0 : i32
    return %arg0, %c0_i32 : i32, i32
  }
}

module attributes {stable_mosaic.version = 11 : i64} {
  func.func @_kernel_resident(%arg0: i32, %arg1: memref<16x32xf32, #tpu.memory_space<vmem>>, %arg2: memref<16x32xf32, #tpu.memory_space<vmem>>, %arg3: memref<32x32xbf16, #tpu.memory_space<vmem>>, %arg4: memref<3x32xf32, #tpu.memory_space<vmem>>, %arg5: memref<16x32xf32, #tpu.memory_space<vmem>>) attributes {dimension_semantics = [#tpu.dimension_semantics<parallel>], iteration_bounds = array<i64: 1>, scalar_prefetch = 0 : i64, scratch_operands = 0 : i64, tpu.core_type = #tpu.core_type<tc>, window_params = [{transform_indices = @transform_0, window_bounds = array<i64: 16, 32>}, {transform_indices = @transform_1, window_bounds = array<i64: 16, 32>}, {pipeline_mode = #tpu.pipeline_mode<synchronous>, transform_indices = @transform_2, window_bounds = array<i64: 32, 32>}, {pipeline_mode = #tpu.pipeline_mode<synchronous>, transform_indices = @transform_3, window_bounds = array<i64: 3, 32>}, {transform_indices = @transform_4, window_bounds = array<i64: 16, 32>}]} {
    %c0 = arith.constant 0 : index
    %c0_0 = arith.constant 0 : index
    %0 = vector.load %arg1[%c0, %c0_0] : memref<16x32xf32, #tpu.memory_space<vmem>>, vector<16x32xf32>
    %1 = arith.truncf %0 : vector<16x32xf32> to vector<16x32xbf16>
    %c0_1 = arith.constant 0 : index
    %c0_2 = arith.constant 0 : index
    %2 = vector.load %arg3[%c0_1, %c0_2] : memref<32x32xbf16, #tpu.memory_space<vmem>>, vector<32x32xbf16>
    %cst = arith.constant dense<0.000000e+00> : vector<16x32xf32>
    %3 = tpu.matmul %1, %2, %cst {dimension_numbers = #tpu.dot_dimension_numbers<[1], [0], [0], [1], [0, 0, 1, 1], [], []>} : vector<16x32xbf16>, vector<32x32xbf16>, vector<16x32xf32> -> vector<16x32xf32>
    %c0_3 = arith.constant 0 : index
    %c0_4 = arith.constant 0 : index
    %4 = vector.load %arg4[%c0_3, %c0_4] : memref<3x32xf32, #tpu.memory_space<vmem>>, vector<1x32xf32>
    %5 = vector.broadcast %4 : vector<1x32xf32> to vector<16x32xf32>
    %6 = arith.addf %3, %5 : vector<16x32xf32>
    %c0_5 = arith.constant 0 : index
    %c0_6 = arith.constant 0 : index
    %7 = vector.load %arg2[%c0_5, %c0_6] : memref<16x32xf32, #tpu.memory_space<vmem>>, vector<16x32xf32>
    %8 = arith.addf %6, %7 : vector<16x32xf32>
    %c1 = arith.constant 1 : index
    %c0_7 = arith.constant 0 : index
    %9 = vector.load %arg4[%c1, %c0_7] : memref<3x32xf32, #tpu.memory_space<vmem>>, vector<1x32xf32>
    %c2 = arith.constant 2 : index
    %c0_8 = arith.constant 0 : index
    %10 = vector.load %arg4[%c2, %c0_8] : memref<3x32xf32, #tpu.memory_space<vmem>>, vector<1x32xf32>
    %cst_9 = arith.constant dense<0.000000e+00> : vector<16xf32>
    %11 = vector.multi_reduction <add>, %8, %cst_9 [1] : vector<16x32xf32> to vector<16xf32>
    %12 = vector.shape_cast %11 : vector<16xf32> to vector<16x1xf32>
    %cst_10 = arith.constant 3.125000e-02 : f32
    %13 = vector.broadcast %cst_10 : f32 to vector<16x1xf32>
    %14 = arith.mulf %12, %13 : vector<16x1xf32>
    %15 = arith.mulf %8, %8 : vector<16x32xf32>
    %cst_11 = arith.constant dense<0.000000e+00> : vector<16xf32>
    %16 = vector.multi_reduction <add>, %15, %cst_11 [1] : vector<16x32xf32> to vector<16xf32>
    %17 = vector.shape_cast %16 : vector<16xf32> to vector<16x1xf32>
    %cst_12 = arith.constant 3.125000e-02 : f32
    %18 = vector.broadcast %cst_12 : f32 to vector<16x1xf32>
    %19 = arith.mulf %17, %18 : vector<16x1xf32>
    %20 = arith.mulf %14, %14 : vector<16x1xf32>
    %21 = arith.subf %19, %20 : vector<16x1xf32>
    %cst_13 = arith.constant 0.000000e+00 : f32
    %22 = vector.broadcast %cst_13 : f32 to vector<16x1xf32>
    %23 = arith.maximumf %21, %22 : vector<16x1xf32>
    %24 = vector.broadcast %14 : vector<16x1xf32> to vector<16x32xf32>
    %25 = arith.subf %8, %24 : vector<16x32xf32>
    %cst_14 = arith.constant 9.99999996E-13 : f32
    %26 = vector.broadcast %cst_14 : f32 to vector<16x1xf32>
    %27 = arith.addf %23, %26 : vector<16x1xf32>
    %28 = math.rsqrt %27 : vector<16x1xf32>
    %29 = vector.broadcast %28 : vector<16x1xf32> to vector<16x32xf32>
    %30 = arith.mulf %25, %29 : vector<16x32xf32>
    %31 = vector.broadcast %9 : vector<1x32xf32> to vector<16x32xf32>
    %32 = arith.mulf %30, %31 : vector<16x32xf32>
    %33 = vector.broadcast %10 : vector<1x32xf32> to vector<16x32xf32>
    %34 = arith.addf %32, %33 : vector<16x32xf32>
    %c0_15 = arith.constant 0 : index
    %c0_16 = arith.constant 0 : index
    %35 = vector.load %arg5[%c0_15, %c0_16] : memref<16x32xf32, #tpu.memory_space<vmem>>, vector<16x32xf32>
    tpu.vector_store %arg5[%c0_15, %c0_16], %34 {strides = array<i32>} : memref<16x32xf32, #tpu.memory_space<vmem>>, vector<16x32xf32>,
    return
  }
  func.func @transform_0(%arg0: i32) -> (i32, i32) {
    %c0_i32 = arith.constant 0 : i32
    %c0_i32_0 = arith.constant 0 : i32
    return %arg0, %c0_i32 : i32, i32
  }
  func.func @transform_1(%arg0: i32) -> (i32, i32) {
    %c0_i32 = arith.constant 0 : i32
    %c0_i32_0 = arith.constant 0 : i32
    return %arg0, %c0_i32 : i32, i32
  }
  func.func @transform_2(%arg0: i32) -> (i32, i32) {
    %c0_i32 = arith.constant 0 : i32
    %c0_i32_0 = arith.constant 0 : i32
    %c0_i32_1 = arith.constant 0 : i32
    return %c0_i32, %c0_i32_0 : i32, i32
  }
  func.func @transform_3(%arg0: i32) -> (i32, i32) {
    %c0_i32 = arith.constant 0 : i32
    %c0_i32_0 = arith.constant 0 : i32
    %c0_i32_1 = arith.constant 0 : i32
    return %c0_i32, %c0_i32_0 : i32, i32
  }
  func.func @transform_4(%arg0: i32) -> (i32, i32) {
    %c0_i32 = arith.constant 0 : i32
    %c0_i32_0 = arith.constant 0 : i32
    return %arg0, %c0_i32 : i32, i32
  }
}

</mosaic_0001>

<bundles_post_ra>
// kernel: tpu_custom_call.1
= control target key start
LH: loop header
LB: loop body
LE: loop exit
PB: predicated region body
PF: predicated region fallthrough
CT: control target
= control target key end

     0   :  { %9 = vsyncpa [#allocation3], 0  ;;  %s424_s0 = inlined_call_operand.hbm [shape: f32[16,32], index: 0, kind: input, shape index: {}]   ;;  %s425_s1 = inlined_call_operand.hbm [shape: f32[16,32], index: 1, kind: input, shape index: {}]   ;;  %s426_s2 = inlined_call_operand.hbm [shape: bf16[32,32], index: 2, kind: input, shape index: {}]   ;;  %s427_s3 = inlined_call_operand.hbm [shape: f32[3,32], index: 3, kind: input, shape index: {}]   ;;  %s428_s4 = inlined_call_operand.hbm [shape: f32[16,32], index: 4, kind: output, shape index: {}]  }
   0x1   :  { %10 = vsyncpa [#allocation6], 0 }
   0x2   :  { %11 = vsyncpa [#allocation9], 0 }
   0x3   :  { %12 = vsyncpa [#allocation4], 0  ;;  %s30_s17 = sshll.u32 %s425_s1, 4  ;;  %s359_s18 = smov [#allocation5]   ;;  %s31_s17 = int_to_ptr.hbm [resolvable:$true] %s30_s17 }
   0x4   :  { %s32_s19 = sshll.u32 %s359_s18, 4  ;;  %s17_s22 = sshll.u32 %s424_s0, 4  ;;  %s33_s19 = int_to_ptr.vmem [resolvable:$true] %s32_s19  ;;  %s18_s22 = int_to_ptr.hbm [resolvable:$true] %s17_s22 }
   0x5   :  { %s360_s23 = smov 128   ;;  %s361_s24 = smov 8  }
   0x6   :  { %38 = dma.hbm_to_vmem [thread:$0]  %s31_s17, 256, %s33_s19, [#allocation6], %s360_s23, %s360_s23, %s361_s24  }
   0x7   :  { %s362_s25 = smov [#allocation2]   ;;  %s43_s1 = sshll.u32 %s426_s2, 4  ;;  %s44_s1 = int_to_ptr.hbm [resolvable:$true] %s43_s1 }
   0x8   :  { %s19_s26 = sshll.u32 %s362_s25, 4  ;;  %s363_s0 = smov [#allocation7]   ;;  %s20_s26 = int_to_ptr.vmem [resolvable:$true] %s19_s26 }
   0x9   :  { %25 = dma.hbm_to_vmem [thread:$0]  %s18_s22, 256, %s20_s26, [#allocation3], %s360_s23, %s360_s23, %s361_s24  }
   0xa   :  { %s45_s29 = sshll.u32 %s363_s0, 4  ;;  %s57_s6 = sshll.u32 %s427_s3, 4  ;;  %s46_s29 = int_to_ptr.vmem [resolvable:$true] %s45_s29  ;;  %s58_s6 = int_to_ptr.hbm [resolvable:$true] %s57_s6 }
   0xb   :  { %s364_s7 = smov 64   ;;  %s365_s8 = smov 4  }
   0xc   :  { %51 = dma.hbm_to_vmem [thread:$0]  %s44_s1, 256, %s46_s29, [#allocation6], %s364_s7, %s364_s7, %s365_s8  }
   0xd   :  { %s366_s9 = smov [#allocation8]  }
   0xe   :  { %s59_s10 = sshll.u32 %s366_s9, 4  ;;  %s60_s10 = int_to_ptr.vmem [resolvable:$true] %s59_s10 }
   0xf   :  { %62 = dma.hbm_to_vmem [thread:$0]  %s58_s6, 64, %s60_s10, [#allocation9]  }
  0x10   :  { %351 = dma.done.wait [#allocation3], 256  }
  0x11   :  { %352 = vsyncadd [#allocation3], 4294967040 }
  0x12   :  { %353 = dma.done.wait [#allocation6], 512  }
  0x13   :  { %354 = vsyncadd [#allocation6], 4294966784 }
  0x14   :  { %355 = dma.done.wait [#allocation9], 64  }
  0x15   :  { %356 = vsyncadd [#allocation9], 4294967232  ;;  %v214_v0 = vld [vmem:[#allocation7 + $0x8] sm:$0xff]  ;;  %v213_v1 = vld [vmem:[#allocation7] sm:$0xff]  ;;  %vm101_vm0 = vcmask 261120   ;;  %s367_s2 = smov [#allocation10]  }
  0x16   :  { %v80_v2 = vld [vmem:[#allocation2] sm:$0xff]  ;;  %111 = vmatpush.bf16.msra.mxu0 %v214_v0  ;;  %v81_v3 = vld [vmem:[#allocation2 + $0x8] sm:$0xff]  ;;  %v224_v5 = vld [vmem:[#allocation8] ss:$0 sm:$0xff]  ;;  %s187_s3 = sshll.u32 %s367_s2, 4  ;;  %s189_s13 = sshll.u32 %s428_s4, 4  ;;  %s188_s3 = int_to_ptr.vmem [resolvable:$true] %s187_s3  ;;  %s190_s13 = int_to_ptr.hbm [resolvable:$true] %s189_s13 }
  0x17   :  { %v82_v4 = vpack.c.bf16 %v81_v3, %v80_v2  ;;  %v119_v7 = vld [vmem:[#allocation5] sm:$0xff]  ;;  %v120_v14 = vld [vmem:[#allocation5 + $0x8] sm:$0xff] }
  0x18   :  { %v225_v45 = vld [vmem:[#allocation8 + $0x1] ss:$0 sm:$0xff]  ;;  %v226_v49 = vld [vmem:[#allocation8 + $0x2] ss:$0 sm:$0xff] }
  0x1a   :  { %112 = vmatpush.bf16.msra.mxu0 %v213_v1 }
  0x1d   :  { %212 = vmatmul.msk.bf16.vlgmr.msra.gmra.mxu0 %vm101_vm0, %v82_v4 }
  0x9a   :  { %v114_v6 = vpop.f32.mrf.mxu0 }
  0x9b   :  { %v115_v8 = vadd.f32 %v224_v5, %v114_v6 }
  0x9d   :  { %v121_v9 = vadd.f32 %v119_v7, %v115_v8 }
  0x9f   :  { %v125_v10 = vsel %vm101_vm0, %v121_v9, 0.0  ;;  %v133_v11 = vmul.f32 %v121_v9, %v121_v9 }
  0xa0   :  { %126 = vadd.xlane.f32.xlu0 %v125_v10 }
  0xa1   :  { %v135_v12 = vsel %vm101_vm0, %v133_v11, 0.0 }
  0xa2   :  { %v116_v13 = vpop.f32.mrf.mxu0  ;;  %136 = vadd.xlane.f32.xlu1 %v135_v12 }
  0xa3   :  { %v117_v15 = vadd.f32 %v224_v5, %v116_v13 }
  0xa5   :  { %v122_v16 = vadd.f32 %v120_v14, %v117_v15 }
  0xa7   :  { %v128_v17 = vsel %vm101_vm0, %v122_v16, 0.0  ;;  %v134_v18 = vmul.f32 %v122_v16, %v122_v16 }
  0xa8   :  { %129 = vadd.xlane.f32.xlu0 %v128_v17 }
  0xa9   :  { %v138_v19 = vsel %vm101_vm0, %v134_v18, 0.0 }
  0xaa   :  { %139 = vadd.xlane.f32.xlu1 %v138_v19 }
 0x113   :  { %v127_v20 = vpop.xlane.xlu0 %126 }
 0x114   :  { %v131_v21 = vmul.f32 0.03125, %v127_v20 }
 0x115   :  { %v137_v22 = vpop.xlane.xlu1 %136 }
 0x116   :  { %v143_v23 = vmul.f32 %v131_v21, %v131_v21  ;;  %v141_v24 = vmul.f32 0.03125, %v137_v22  ;;  %v149_v43 = vsub.f32 %v121_v9, %v131_v21 }
 0x118   :  { %v145_v25 = vsub.f32 %v141_v24, %v143_v23 }
 0x11a   :  { %v147_v26 = vmax.f32 %v145_v25, 0.0 }
 0x11b   :  { %v130_v27 = vpop.xlane.xlu0 %129 }
 0x11c   :  { %v151_v28 = vadd.f32 1e-12, %v147_v26  ;;  %v132_v29 = vmul.f32 0.03125, %v130_v27 }
 0x11d   :  { %v140_v30 = vpop.xlane.xlu1 %139 }
 0x11e   :  { %227 = vrsqrt.f32 %v151_v28  ;;  %v144_v31 = vmul.f32 %v132_v29, %v132_v29  ;;  %v142_v32 = vmul.f32 0.03125, %v140_v30  ;;  %vm159_vm2 = vweird.f32 %v151_v28 }
 0x11f   :  { %v150_v55 = vsub.f32 %v122_v16, %v132_v29 }
 0x120   :  { %v146_v33 = vsub.f32 %v142_v32, %v144_v31 }
 0x122   :  { %v148_v34 = vmax.f32 %v146_v33, 0.0 }
 0x124   :  { %v228_v35 = vpop.eup %227  ;;  %v152_v37 = vadd.f32 1e-12, %v148_v34 }
 0x125   :  { %v154_v36 = vmul.f32 %v228_v35, %v151_v28  ;;  %vm160_vm1 = vweird.f32 %v228_v35 }
 0x126   :  { %229 = vrsqrt.f32 %v152_v37  ;;  %vm161_vm3 = vmor %vm159_vm2, %vm160_vm1  ;;  %vm169_vm5 = vweird.f32 %v152_v37 }
 0x127   :  { %v155_v38 = vmul.f32 %v228_v35, %v154_v36 }
 0x129   :  { %v156_v39 = vmul.f32 0.5, %v155_v38 }
 0x12b   :  { %v157_v40 = vsub.f32 1.5, %v156_v39 }
 0x12c   :  { %v230_v41 = vpop.eup %229 }
 0x12d   :  { %v158_v42 = vmul.f32 %v228_v35, %v157_v40  ;;  %v164_v44 = vmul.f32 %v230_v41, %v152_v37  ;;  %vm170_vm4 = vweird.f32 %v230_v41 }
 0x12e   :  { %vm171_vm6 = vmor %vm169_vm5, %vm170_vm4 }
 0x12f   :  { %v162_v46 = vsel %vm161_vm3, %v228_v35, %v158_v42  ;;  %v165_v48 = vmul.f32 %v230_v41, %v164_v44 }
 0x130   :  { %v173_v47 = vmul.f32 %v162_v46, %v149_v43 }
 0x131   :  { %v166_v50 = vmul.f32 0.5, %v165_v48 }
 0x132   :  { %v176_v51 = vmul.f32 %v225_v45, %v173_v47 }
 0x133   :  { %v167_v52 = vsub.f32 1.5, %v166_v50 }
 0x134   :  { %v179_v53 = vadd.f32 %v226_v49, %v176_v51 }
 0x135   :  { %v168_v54 = vmul.f32 %v230_v41, %v167_v52 }
 0x136   :  { %181 = vst.msk [vmem:[#allocation10] sm:$0xff] %vm101_vm0, %v179_v53 }
 0x137   :  { %v172_v56 = vsel %vm171_vm6, %v230_v41, %v168_v54 }
 0x138   :  { %v174_v57 = vmul.f32 %v172_v56, %v150_v55 }
 0x13a   :  { %v177_v58 = vmul.f32 %v225_v45, %v174_v57 }
 0x13c   :  { %v180_v59 = vadd.f32 %v226_v49, %v177_v58 }
 0x13e   :  { %182 = vst.msk [vmem:[#allocation10 + $0x8] sm:$0xff] %vm101_vm0, %v180_v59 }
 0x13f   :  { %195 = dma.vmem_to_hbm [thread:$0]  %s188_s3, 256, %s190_s13, [#allocation4], %s360_s23, %s360_s23, %s361_s24  }
 0x140   :  { %357 = dma.done.wait [#allocation4], 256  }
 0x141   :  { %358 = vsyncadd [#allocation4], 4294967040 }
 0x142   :  { %200 = vsyncpa [#allocation3], 1 }
 0x143   :  { %201 = vsyncpa [#allocation6], 1 }
 0x144   :  { %202 = vsyncpa [#allocation9], 1 }
 0x145   :  { %203 = vsyncpa [#allocation4], 1 }

// kernel: tpu_custom_call.1
= control target key start
LH: loop header
LB: loop body
LE: loop exit
PB: predicated region body
PF: predicated region fallthrough
CT: control target
= control target key end

     0   :  { %9 = vsyncpa [#allocation3], 0  ;;  %s424_s0 = inlined_call_operand.hbm [shape: f32[16,32], index: 0, kind: input, shape index: {}]   ;;  %s425_s1 = inlined_call_operand.hbm [shape: f32[16,32], index: 1, kind: input, shape index: {}]   ;;  %s426_s2 = inlined_call_operand.hbm [shape: bf16[32,32], index: 2, kind: input, shape index: {}]   ;;  %s427_s3 = inlined_call_operand.hbm [shape: f32[3,32], index: 3, kind: input, shape index: {}]   ;;  %s428_s4 = inlined_call_operand.hbm [shape: f32[16,32], index: 4, kind: output, shape index: {}]  }
   0x1   :  { %10 = vsyncpa [#allocation6], 0 }
   0x2   :  { %11 = vsyncpa [#allocation9], 0 }
   0x3   :  { %12 = vsyncpa [#allocation4], 0  ;;  %s30_s17 = sshll.u32 %s425_s1, 4  ;;  %s359_s18 = smov [#allocation5]   ;;  %s31_s17 = int_to_ptr.hbm [resolvable:$true] %s30_s17 }
   0x4   :  { %s32_s19 = sshll.u32 %s359_s18, 4  ;;  %s17_s22 = sshll.u32 %s424_s0, 4  ;;  %s33_s19 = int_to_ptr.vmem [resolvable:$true] %s32_s19  ;;  %s18_s22 = int_to_ptr.hbm [resolvable:$true] %s17_s22 }
   0x5   :  { %s360_s23 = smov 128   ;;  %s361_s24 = smov 8  }
   0x6   :  { %38 = dma.hbm_to_vmem [thread:$0]  %s31_s17, 256, %s33_s19, [#allocation6], %s360_s23, %s360_s23, %s361_s24  }
   0x7   :  { %s362_s25 = smov [#allocation2]   ;;  %s43_s1 = sshll.u32 %s426_s2, 4  ;;  %s44_s1 = int_to_ptr.hbm [resolvable:$true] %s43_s1 }
   0x8   :  { %s19_s26 = sshll.u32 %s362_s25, 4  ;;  %s363_s0 = smov [#allocation7]   ;;  %s20_s26 = int_to_ptr.vmem [resolvable:$true] %s19_s26 }
   0x9   :  { %25 = dma.hbm_to_vmem [thread:$0]  %s18_s22, 256, %s20_s26, [#allocation3], %s360_s23, %s360_s23, %s361_s24  }
   0xa   :  { %s45_s29 = sshll.u32 %s363_s0, 4  ;;  %s57_s6 = sshll.u32 %s427_s3, 4  ;;  %s46_s29 = int_to_ptr.vmem [resolvable:$true] %s45_s29  ;;  %s58_s6 = int_to_ptr.hbm [resolvable:$true] %s57_s6 }
   0xb   :  { %s364_s7 = smov 64   ;;  %s365_s8 = smov 4  }
   0xc   :  { %51 = dma.hbm_to_vmem [thread:$0]  %s44_s1, 256, %s46_s29, [#allocation6], %s364_s7, %s364_s7, %s365_s8  }
   0xd   :  { %s366_s9 = smov [#allocation8]  }
   0xe   :  { %s59_s10 = sshll.u32 %s366_s9, 4  ;;  %s60_s10 = int_to_ptr.vmem [resolvable:$true] %s59_s10 }
   0xf   :  { %62 = dma.hbm_to_vmem [thread:$0]  %s58_s6, 64, %s60_s10, [#allocation9]  }
  0x10   :  { %351 = dma.done.wait [#allocation3], 256  }
  0x11   :  { %352 = vsyncadd [#allocation3], 4294967040 }
  0x12   :  { %353 = dma.done.wait [#allocation6], 512  }
  0x13   :  { %354 = vsyncadd [#allocation6], 4294966784 }
  0x14   :  { %355 = dma.done.wait [#allocation9], 64  }
  0x15   :  { %356 = vsyncadd [#allocation9], 4294967232  ;;  %v214_v0 = vld [vmem:[#allocation7 + $0x8] sm:$0xff]  ;;  %v213_v1 = vld [vmem:[#allocation7] sm:$0xff]  ;;  %vm101_vm0 = vcmask 261120   ;;  %s367_s2 = smov [#allocation10]  }
  0x16   :  { %v80_v2 = vld [vmem:[#allocation2] sm:$0xff]  ;;  %111 = vmatpush.bf16.msra.mxu0 %v214_v0  ;;  %v81_v3 = vld [vmem:[#allocation2 + $0x8] sm:$0xff]  ;;  %v224_v5 = vld [vmem:[#allocation8] ss:$0 sm:$0xff]  ;;  %s187_s3 = sshll.u32 %s367_s2, 4  ;;  %s189_s13 = sshll.u32 %s428_s4, 4  ;;  %s188_s3 = int_to_ptr.vmem [resolvable:$true] %s187_s3  ;;  %s190_s13 = int_to_ptr.hbm [resolvable:$true] %s189_s13 }
  0x17   :  { %v82_v4 = vpack.c.bf16 %v81_v3, %v80_v2  ;;  %v119_v7 = vld [vmem:[#allocation5] sm:$0xff]  ;;  %v120_v14 = vld [vmem:[#allocation5 + $0x8] sm:$0xff] }
  0x18   :  { %v225_v45 = vld [vmem:[#allocation8 + $0x1] ss:$0 sm:$0xff]  ;;  %v226_v49 = vld [vmem:[#allocation8 + $0x2] ss:$0 sm:$0xff] }
  0x1a   :  { %112 = vmatpush.bf16.msra.mxu0 %v213_v1 }
  0x1d   :  { %212 = vmatmul.msk.bf16.vlgmr.msra.gmra.mxu0 %vm101_vm0, %v82_v4 }
  0x9a   :  { %v114_v6 = vpop.f32.mrf.mxu0 }
  0x9b   :  { %v115_v8 = vadd.f32 %v224_v5, %v114_v6 }
  0x9d   :  { %v121_v9 = vadd.f32 %v119_v7, %v115_v8 }
  0x9f   :  { %v125_v10 = vsel %vm101_vm0, %v121_v9, 0.0  ;;  %v133_v11 = vmul.f32 %v121_v9, %v121_v9 }
  0xa0   :  { %126 = vadd.xlane.f32.xlu0 %v125_v10 }
  0xa1   :  { %v135_v12 = vsel %vm101_vm0, %v133_v11, 0.0 }
  0xa2   :  { %v116_v13 = vpop.f32.mrf.mxu0  ;;  %136 = vadd.xlane.f32.xlu1 %v135_v12 }
  0xa3   :  { %v117_v15 = vadd.f32 %v224_v5, %v116_v13 }
  0xa5   :  { %v122_v16 = vadd.f32 %v120_v14, %v117_v15 }
  0xa7   :  { %v128_v17 = vsel %vm101_vm0, %v122_v16, 0.0  ;;  %v134_v18 = vmul.f32 %v122_v16, %v122_v16 }
  0xa8   :  { %129 = vadd.xlane.f32.xlu0 %v128_v17 }
  0xa9   :  { %v138_v19 = vsel %vm101_vm0, %v134_v18, 0.0 }
  0xaa   :  { %139 = vadd.xlane.f32.xlu1 %v138_v19 }
 0x113   :  { %v127_v20 = vpop.xlane.xlu0 %126 }
 0x114   :  { %v131_v21 = vmul.f32 0.03125, %v127_v20 }
 0x115   :  { %v137_v22 = vpop.xlane.xlu1 %136 }
 0x116   :  { %v143_v23 = vmul.f32 %v131_v21, %v131_v21  ;;  %v141_v24 = vmul.f32 0.03125, %v137_v22  ;;  %v149_v43 = vsub.f32 %v121_v9, %v131_v21 }
 0x118   :  { %v145_v25 = vsub.f32 %v141_v24, %v143_v23 }
 0x11a   :  { %v147_v26 = vmax.f32 %v145_v25, 0.0 }
 0x11b   :  { %v130_v27 = vpop.xlane.xlu0 %129 }
 0x11c   :  { %v151_v28 = vadd.f32 1e-12, %v147_v26  ;;  %v132_v29 = vmul.f32 0.03125, %v130_v27 }
 0x11d   :  { %v140_v30 = vpop.xlane.xlu1 %139 }
 0x11e   :  { %227 = vrsqrt.f32 %v151_v28  ;;  %v144_v31 = vmul.f32 %v132_v29, %v132_v29  ;;  %v142_v32 = vmul.f32 0.03125, %v140_v30  ;;  %vm159_vm2 = vweird.f32 %v151_v28 }
 0x11f   :  { %v150_v55 = vsub.f32 %v122_v16, %v132_v29 }
 0x120   :  { %v146_v33 = vsub.f32 %v142_v32, %v144_v31 }
 0x122   :  { %v148_v34 = vmax.f32 %v146_v33, 0.0 }
 0x124   :  { %v228_v35 = vpop.eup %227  ;;  %v152_v37 = vadd.f32 1e-12, %v148_v34 }
 0x125   :  { %v154_v36 = vmul.f32 %v228_v35, %v151_v28  ;;  %vm160_vm1 = vweird.f32 %v228_v35 }
 0x126   :  { %229 = vrsqrt.f32 %v152_v37  ;;  %vm161_vm3 = vmor %vm159_vm2, %vm160_vm1  ;;  %vm169_vm5 = vweird.f32 %v152_v37 }
 0x127   :  { %v155_v38 = vmul.f32 %v228_v35, %v154_v36 }
 0x129   :  { %v156_v39 = vmul.f32 0.5, %v155_v38 }
 0x12b   :  { %v157_v40 = vsub.f32 1.5, %v156_v39 }
 0x12c   :  { %v230_v41 = vpop.eup %229 }
 0x12d   :  { %v158_v42 = vmul.f32 %v228_v35, %v157_v40  ;;  %v164_v44 = vmul.f32 %v230_v41, %v152_v37  ;;  %vm170_vm4 = vweird.f32 %v230_v41 }
 0x12e   :  { %vm171_vm6 = vmor %vm169_vm5, %vm170_vm4 }
 0x12f   :  { %v162_v46 = vsel %vm161_vm3, %v228_v35, %v158_v42  ;;  %v165_v48 = vmul.f32 %v230_v41, %v164_v44 }
 0x130   :  { %v173_v47 = vmul.f32 %v162_v46, %v149_v43 }
 0x131   :  { %v166_v50 = vmul.f32 0.5, %v165_v48 }
 0x132   :  { %v176_v51 = vmul.f32 %v225_v45, %v173_v47 }
 0x133   :  { %v167_v52 = vsub.f32 1.5, %v166_v50 }
 0x134   :  { %v179_v53 = vadd.f32 %v226_v49, %v176_v51 }
 0x135   :  { %v168_v54 = vmul.f32 %v230_v41, %v167_v52 }
 0x136   :  { %181 = vst.msk [vmem:[#allocation10] sm:$0xff] %vm101_vm0, %v179_v53 }
 0x137   :  { %v172_v56 = vsel %vm171_vm6, %v230_v41, %v168_v54 }
 0x138   :  { %v174_v57 = vmul.f32 %v172_v56, %v150_v55 }
 0x13a   :  { %v177_v58 = vmul.f32 %v225_v45, %v174_v57 }
 0x13c   :  { %v180_v59 = vadd.f32 %v226_v49, %v177_v58 }
 0x13e   :  { %182 = vst.msk [vmem:[#allocation10 + $0x8] sm:$0xff] %vm101_vm0, %v180_v59 }
 0x13f   :  { %195 = dma.vmem_to_hbm [thread:$0]  %s188_s3, 256, %s190_s13, [#allocation4], %s360_s23, %s360_s23, %s361_s24  }
 0x140   :  { %357 = dma.done.wait [#allocation4], 256  }
 0x141   :  { %358 = vsyncadd [#allocation4], 4294967040 }
 0x142   :  { %200 = vsyncpa [#allocation3], 1 }
 0x143   :  { %201 = vsyncpa [#allocation6], 1 }
 0x144   :  { %202 = vsyncpa [#allocation9], 1 }
 0x145   :  { %203 = vsyncpa [#allocation4], 1 }

</bundles_post_ra>
